<compile_context>
chip_gen: v7x
topology: tpu7x:2x2x1
jax: 0.10.0
libtpu: 0.0.40
codegen_flags: <defaults>
</compile_context>

<pallas_src>
import jax
import jax.numpy as jnp
from jax.experimental import pallas as pl
from jax.experimental.pallas import tpu as pltpu


def _build_pe_table(d_model: int, max_len: int = 1000) -> jnp.ndarray:
    """Deterministic sinusoidal table, identical math to the torch __init__."""
    # The torch original also breaks for odd d_model; make the restriction explicit.
    assert d_model % 2 == 0, "sinusoidal PE table requires even d_model"
    position = jnp.arange(0, max_len, dtype=jnp.float32)[:, None]            # (max_len, 1)
    div_term = jnp.exp(
        jnp.arange(0, d_model, 2, dtype=jnp.float32)
        * (-jnp.log(jnp.float32(10000.0)) / d_model)
    )                                                                         # (d_model/2,)
    pe = jnp.zeros((max_len, d_model), dtype=jnp.float32)
    pe = pe.at[:, 0::2].set(jnp.sin(position * div_term))
    pe = pe.at[:, 1::2].set(jnp.cos(position * div_term))
    return pe


def _add_pe_kernel(x_ref, pe_ref, o_ref):
    # x_ref: (TS, B*D) tile in VMEM; pe_ref: (1, B*D) resident in VMEM across all grid steps.
    # out[s, f] = x[s, f] + pe[0, f]  -> pure VPU elementwise add with a sublane broadcast.
    o_ref[...] = x_ref[...] + pe_ref[...]


def _pick_tile_rows(S: int, row_bytes: int, vmem_budget_bytes: int = 8 * 1024 * 1024) -> int:
    """Largest row-tile (multiple of 8) whose double-buffered in+out tiles fit the budget.

    Budget is conservative (8 MiB for the x/out tiles) so the same choice is safe under
    v5e's 16 MiB scoped default, v6e's 32 MiB, and v7x's 64 MiB physical VMEM.
    """
    # 2x-buffered input tile + 2x-buffered output tile => 4 live copies.
    max_rows = max(8, vmem_budget_bytes // (4 * max(row_bytes, 1)))
    if max_rows >= S:
        return S                      # single block == full dim (always legal)
    return max(8, (max_rows // 8) * 8)  # keep sublane alignment for partial tiling


def positional_encoding_forward(x: jnp.ndarray, pe_table: jnp.ndarray) -> jnp.ndarray:
    """x: (S, B, D) with B == S (required by the original .repeat broadcasting)."""
    S, B, D = x.shape
    assert B == S, "original module's repeat() broadcasting requires batch == seq"
    dtype = x.dtype

    # Glue slicing / dtype handling stays in plain JAX; explicit cast avoids upcasting
    # the whole tensor to f32 when x is bf16.
    pe_slice = pe_table[:S, :].astype(dtype)          # (B, D) since B == S

    # Lane-dense flattening: (S, B, D) and (S, B*D) are bit-identical row-major.
    BD = B * D
    x2 = x.reshape(S, BD)
    pe2 = pe_slice.reshape(1, BD)

    ts = _pick_tile_rows(S, BD * jnp.dtype(dtype).itemsize)
    grid = (pl.cdiv(S, ts),)

    out2 = pl.pallas_call(
        _add_pe_kernel,
        out_shape=jax.ShapeDtypeStruct((S, BD), dtype),
        grid=grid,
        in_specs=[
            pl.BlockSpec((ts, BD), lambda i: (i, 0)),   # tiled x rows, pipelined
            pl.BlockSpec((1, BD), lambda i: (0, 0)),    # pe row: DMA'd once, stays resident
        ],
        out_specs=pl.BlockSpec((ts, BD), lambda i: (i, 0)),
        compiler_params=pltpu.CompilerParams(dimension_semantics=("parallel",)),
    )(x2, pe2)

    return out2.reshape(S, B, D)


if __name__ == "__main__":
    d_model = 32
    max_len = 1000
    seq = 8          # batch must equal seq for the original forward to be well-formed
    batch = 8

    pe_table = _build_pe_table(d_model, max_len)

    key = jax.random.PRNGKey(0)
    x = jax.random.normal(key, (seq, batch, d_model), dtype=jnp.float32)

    out = positional_encoding_forward(x, pe_table)
    out = jax.block_until_ready(out)

    # Reference check against pure-JAX reproduction of the torch forward.
    ref = x + jnp.tile(pe_table[:seq, :][None, :, :], (seq, 1, 1))
    assert out.shape == (seq, batch, d_model)
    assert jnp.allclose(out, ref, atol=1e-6), "mismatch vs reference"

    print("KERNEL_OK")
</pallas_src>

<mosaic_0001>
module attributes {stable_mosaic.version = 11 : i64} {
  func.func @_add_pe_kernel(%arg0: i32, %arg1: memref<8x256xf32, #tpu.memory_space<vmem>>, %arg2: memref<1x256xf32, #tpu.memory_space<vmem>>, %arg3: memref<8x256xf32, #tpu.memory_space<vmem>>) attributes {dimension_semantics = [#tpu.dimension_semantics<parallel>], iteration_bounds = array<i64: 1>, scalar_prefetch = 0 : i64, scratch_operands = 0 : i64, tpu.core_type = #tpu.core_type<tc>, window_params = [{transform_indices = @transform_0, window_bounds = array<i64: 8, 256>}, {pipeline_mode = #tpu.pipeline_mode<synchronous>, transform_indices = @transform_1, window_bounds = array<i64: 1, 256>}, {transform_indices = @transform_2, window_bounds = array<i64: 8, 256>}]} {
    %c0 = arith.constant 0 : index
    %c0_0 = arith.constant 0 : index
    %0 = vector.load %arg1[%c0, %c0_0] : memref<8x256xf32, #tpu.memory_space<vmem>>, vector<8x256xf32>
    %c0_1 = arith.constant 0 : index
    %c0_2 = arith.constant 0 : index
    %1 = vector.load %arg2[%c0_1, %c0_2] : memref<1x256xf32, #tpu.memory_space<vmem>>, vector<1x256xf32>
    %2 = vector.broadcast %1 : vector<1x256xf32> to vector<8x256xf32>
    %3 = arith.addf %0, %2 : vector<8x256xf32>
    %c0_3 = arith.constant 0 : index
    %c0_4 = arith.constant 0 : index
    %4 = vector.load %arg3[%c0_3, %c0_4] : memref<8x256xf32, #tpu.memory_space<vmem>>, vector<8x256xf32>
    tpu.vector_store %arg3[%c0_3, %c0_4], %3 {strides = array<i32>} : memref<8x256xf32, #tpu.memory_space<vmem>>, vector<8x256xf32>,
    return
  }
  func.func @transform_0(%arg0: i32) -> (i32, i32) {
    %c0_i32 = arith.constant 0 : i32
    %c0_i32_0 = arith.constant 0 : i32
    return %arg0, %c0_i32 : i32, i32
  }
  func.func @transform_1(%arg0: i32) -> (i32, i32) {
    %c0_i32 = arith.constant 0 : i32
    %c0_i32_0 = arith.constant 0 : i32
    %c0_i32_1 = arith.constant 0 : i32
    return %c0_i32, %c0_i32_0 : i32, i32
  }
  func.func @transform_2(%arg0: i32) -> (i32, i32) {
    %c0_i32 = arith.constant 0 : i32
    %c0_i32_0 = arith.constant 0 : i32
    return %arg0, %c0_i32 : i32, i32
  }
}

</mosaic_0001>

<bundles_post_ra>
// kernel: tpu_custom_call.1
= control target key start
LH: loop header
LB: loop body
LE: loop exit
PB: predicated region body
PF: predicated region fallthrough
CT: control target
= control target key end

     0   :  { %7 = vsyncpa [#allocation3], 0  ;;  %s151_s0 = inlined_call_operand.hbm [shape: f32[8,256], index: 0, kind: input, shape index: {}]   ;;  %s152_s1 = inlined_call_operand.vmem [shape: f32[1,256], index: 1, kind: input, shape index: {}]   ;;  %s153_s2 = inlined_call_operand.hbm [shape: f32[8,256], index: 2, kind: output, shape index: {}]  }
   0x1   :  { %8 = vsyncpa [#allocation4], 0  ;;  %s107_s9 = smov [#allocation2]   ;;  %s59_s13 = scalar_lea.hbm %s151_s0, 256 }
   0x2   :  { %s15_s10 = sshll.u32 %s107_s9, 4  ;;  %p60_p0 = scmp.ne.s32.totalorder %s151_s0, %s59_s13  ;;  %s16_s10 = int_to_ptr.vmem [resolvable:$true] %s15_s10 }
   0x3   :  { %p63_p1 = scmp.lt.u32.totalorder %s59_s13, %s151_s0 }
   0x5   :  { %p65_p2 = pnand %p63_p1, %p60_p0 }
   0x7   :  { %68 = shalt.err (!%p65_p2)
}
   0x8   :  { %s69_s18 = scalar_lea.vmem %s16_s10, 256  ;;  %p74_p4 = scmp.lt.s32.totalorder %s16_s10, %s16_s10 }
   0x9   :  { %p70_p3 = scmp.ne.s32.totalorder %s16_s10, %s69_s18  ;;  %p75_p5 = scmp.lt.s32.totalorder %s69_s18, %s69_s18 }
   0xb   :  { %p76_p6 = por %p75_p5, %p74_p4 }
   0xd   :  { %p77_p7 = pnand %p76_p6, %p70_p3 }
   0xf   :  { %80 = shalt.err (!%p77_p7)
}
  0x10   :  { %18 = dma.hbm_to_vmem [thread:$0]  %s151_s0, 256, %s16_s10, [#allocation3]  }
  0x11   :  { %103 = dma.done.wait [#allocation3], 256  }
  0x12   :  { %104 = vsyncadd [#allocation3], 4294967040  ;;  %v28_v0 = vlaneseq  ;;  %v24_v4 = vld [vmem:[#allocation2] sm:$0xff]  ;;  %v25_v6 = vld [vmem:[#allocation2 + $0x8] sm:$0xff]  ;;  %s108_s23 = smov [#allocation5]  }
  0x13   :  { %v26_v5 = vld [vmem:[%s152_s1] sm:$0x3]  ;;  %s48_s24 = sshll.u32 %s108_s23, 4  ;;  %s49_s24 = int_to_ptr.vmem [resolvable:$true] %s48_s24 }
  0x14   :  { %v29_v1 = vshrl.u32 %v28_v0, 7  ;;  %s81_s0 = scalar_lea.vmem %s49_s24, 256  ;;  %p86_p9 = scmp.lt.s32.totalorder %s49_s24, %s49_s24 }
  0x15   :  { %p82_p8 = scmp.ne.s32.totalorder %s49_s24, %s81_s0  ;;  %p87_p10 = scmp.lt.s32.totalorder %s81_s0, %s81_s0 }
  0x16   :  { %v30_v2 = vsub.s32 0, %v29_v1  ;;  %v34_v3 = vsub.s32 1, %v29_v1 }
  0x17   :  { %p88_p11 = por %p87_p10, %p86_p9 }
  0x18   :  { %v31_v7 = vrot.slane %v26_v5, %v30_v2  ;;  %v35_v8 = vrot.slane %v26_v5, %v34_v3 }
  0x19   :  { %p89_p12 = pnand %p88_p11, %p82_p8 }
  0x1a   :  { %v38_v9 = vadd.f32 %v31_v7, %v24_v4  ;;  %v39_v10 = vadd.f32 %v35_v8, %v25_v6 }
  0x1c   :  { %40 = vst [vmem:[#allocation5] sm:$0xff] %v38_v9  ;;  %41 = vst [vmem:[#allocation5 + $0x8] sm:$0xff] %v39_v10 }
  0x1d   :  { %92 = shalt.err (!%p89_p12)
}
  0x1e   :  { %s93_s1 = scalar_lea.hbm %s153_s2, 256 }
  0x1f   :  { %p94_p13 = scmp.ne.s32.totalorder %s153_s2, %s93_s1  ;;  %p97_p0 = scmp.lt.u32.totalorder %s93_s1, %s153_s2 }
  0x21   :  { %p99_p1 = pnand %p97_p0, %p94_p13 }
  0x23   :  { %102 = shalt.err (!%p99_p1)
}
  0x24   :  { %51 = dma.vmem_to_hbm [thread:$0]  %s49_s24, 256, %s153_s2, [#allocation4]  }
  0x25   :  { %105 = dma.done.wait [#allocation4], 256  }
  0x26   :  { %106 = vsyncadd [#allocation4], 4294967040 }
  0x27   :  { %55 = vsyncpa [#allocation3], 1 }
  0x28   :  { %56 = vsyncpa [#allocation4], 1 }

</bundles_post_ra>
